<compile_context>
chip_gen: v5e
topology: v5e:2x2
jax: 0.10.0
libtpu: 0.0.40
codegen_flags: <defaults>
</compile_context>

<pallas_src>
import numpy as np
import jax
import jax.numpy as jnp
from jax import lax
from jax.experimental import pallas as pl
from jax.experimental.pallas import tpu as pltpu


def _round_up(a: int, b: int) -> int:
    return (a + b - 1) // b * b


def cox_kernel(x_ref, w_ref, h0_ref, h0p_ref, sf_ref, ss_ref):
    x = x_ref[...]                                    # (TILE_N, D)
    w = w_ref[...]                                    # (1, D)
    h0 = h0_ref[...]                                  # (1, T_pad): -log(S_km)*exp(bias), zero past t_valid
    h0p = h0p_ref[...]                                # (1, T_pad): h0 shifted right by one, zero elsewhere

    d = x.shape[-1]
    if d >= 128:
        # large feature dim: push the dot product to the (otherwise idle) MXU
        z = lax.dot_general(x, w, (((1,), (1,)), ((), ())),
                            preferred_element_type=jnp.float32)   # (TILE_N, 1)
    else:
        # small feature dim: VPU multiply + lane reduce is fine
        z = jnp.sum(x * w, axis=-1, keepdims=True)                # (TILE_N, 1)
    cox = jnp.exp(z)                                              # (TILE_N, 1)

    # surv_func = exp(-H0 * cox), clamped below at 1e-7 (masked_scatter in torch)
    sf = jnp.maximum(jnp.exp(-h0 * cox), jnp.float32(1e-7))       # (TILE_N, T_pad)
    sf_ref[...] = sf

    # "previous" survival: exp(-H0[j-1]*cox) for j>=1, exp(0)=1 for j=0,
    # and 1 in the padded lanes (so steps there are exactly 0).
    sf_prev = jnp.maximum(jnp.exp(-h0p * cox), jnp.float32(1e-7))

    # steps[:, 0] = 1 - sf[:, 0];  steps[:, j] = sf[:, j-1] - sf[:, j]
    steps = sf_prev - sf

    # normalize rows; rows whose step-sum < 1e-7 become all zeros
    s = jnp.sum(steps, axis=-1, keepdims=True)                    # (TILE_N, 1)
    bad = s < jnp.float32(1e-7)
    s_safe = jnp.where(bad, jnp.float32(1.0), s)
    steps = steps / s_safe
    steps = jnp.where(bad, jnp.float32(0.0), steps)
    ss_ref[...] = steps


def cox_forward(x, w, b, h0, *, tile_n: int = 1024):
    """surv_func, surv_steps = Cox._internal_fwd(x) with baseline H0 = -log(S_km)."""
    x = jnp.asarray(x, jnp.float32)
    n, d = x.shape
    h0_flat = jnp.asarray(h0, jnp.float32).reshape(-1)
    t = int(h0_flat.shape[0])

    # Fold the Linear bias into the baseline: exp(xw + b) * H0 == exp(xw) * (H0 * exp(b)).
    eb = jnp.exp(jnp.asarray(b, jnp.float32).reshape(()))
    h0_eff = h0_flat * eb                                          # (t,)
    h0_prev = jnp.concatenate([jnp.zeros((1,), jnp.float32), h0_eff[:-1]])

    # Lane-dense time axis: pad to a multiple of 128, slice back at the end.
    # Padded lanes are zero in both baselines -> steps there are exactly 0.
    t_pad = _round_up(max(t, 1), 128)
    h0_cur_p = jnp.zeros((1, t_pad), jnp.float32).at[0, :t].set(h0_eff)
    h0_prev_p = jnp.zeros((1, t_pad), jnp.float32).at[0, :t].set(h0_prev)

    # Tile over N (multiple of 8 sublanes); pad N with zero rows if needed.
    tile_n = max(8, min(_round_up(tile_n, 8), _round_up(n, 8)))
    n_pad = _round_up(n, tile_n)
    if n_pad != n:
        x = jnp.pad(x, ((0, n_pad - n), (0, 0)))

    w2 = jnp.asarray(w, jnp.float32).reshape(1, d)

    # VMEM budget: double-buffered x tile + two output tiles (+ tiny w / h0 blocks).
    tile_bytes = 4 * (tile_n * d + 2 * tile_n * t_pad)
    vmem_limit = int(min(max(2 * tile_bytes + (2 << 20), 16 << 20), 64 << 20))

    sf, ss = pl.pallas_call(
        cox_kernel,
        out_shape=(jax.ShapeDtypeStruct((n_pad, t_pad), jnp.float32),
                   jax.ShapeDtypeStruct((n_pad, t_pad), jnp.float32)),
        grid=(n_pad // tile_n,),
        in_specs=[
            pl.BlockSpec((tile_n, d), lambda i: (i, 0)),      # x tile
            pl.BlockSpec((1, d), lambda i: (0, 0)),           # weight (reused every step)
            pl.BlockSpec((1, t_pad), lambda i: (0, 0)),       # baseline hazard (reused)
            pl.BlockSpec((1, t_pad), lambda i: (0, 0)),       # shifted baseline hazard (reused)
        ],
        out_specs=(
            pl.BlockSpec((tile_n, t_pad), lambda i: (i, 0)),  # surv_func
            pl.BlockSpec((tile_n, t_pad), lambda i: (i, 0)),  # surv_steps
        ),
        compiler_params=pltpu.CompilerParams(
            dimension_semantics=("parallel",),
            vmem_limit_bytes=vmem_limit,
        ),
    )(x, w2, h0_cur_p, h0_prev_p)
    return sf[:n, :t], ss[:n, :t]


if __name__ == "__main__":
    key = jax.random.PRNGKey(0)
    k1, k2, k3, k4 = jax.random.split(key, 4)

    N, T = 8, 16           # samples, event-time grid length
    D1, D2 = 16, 16        # two feature blocks in the input list `c`
    D = D1 + D2

    # forward() input: list of tensors; f_proba=False -> plain concat (glue in JAX)
    c0 = jax.random.normal(k1, (N, D1), dtype=jnp.float32)
    c1 = jax.random.normal(k2, (N, D2), dtype=jnp.float32)
    x = jnp.concatenate([c0, c1], axis=-1)
    # TODO(synk): f_proba=True softmax preprocessing and the 'breslow' baseline
    # (training-set cumsum via DataLoader) are init-time/data-dependent; only the
    # default km forward path is kernelized.

    # Linear(D, 1) parameters, PyTorch-style uniform(-1/sqrt(D), 1/sqrt(D)) init
    bound = 1.0 / np.sqrt(D)
    w = jax.random.uniform(k3, (1, D), minval=-bound, maxval=bound, dtype=jnp.float32)
    b = jax.random.uniform(k4, (1, 1), minval=-bound, maxval=bound, dtype=jnp.float32)

    # deterministic Kaplan-Meier-like survival curve -> baseline H0 = -log(S_km)
    s_km = jnp.cumprod(jnp.full((T,), 0.93, dtype=jnp.float32))
    s_km = jnp.maximum(s_km, 1e-13)
    h0 = (-jnp.log(s_km)).reshape(1, T)

    surv_func, surv_steps = cox_forward(x, w, b, h0)
    jax.block_until_ready((surv_func, surv_steps))

    # pure-JAX reference of _internal_fwd for a correctness sanity check
    cox = jnp.exp(x @ w.T + b[0, 0])
    sf_ref = jnp.exp(-h0 * cox)
    sf_ref = jnp.where(sf_ref < 1e-7, 1e-7, sf_ref)
    first = 1.0 - sf_ref[:, :1]
    rest = sf_ref[:, :-1] - sf_ref[:, 1:]
    steps_ref = jnp.concatenate([first, rest], axis=-1)
    ssum = jnp.sum(steps_ref, axis=-1, keepdims=True)
    bad = ssum < 1e-7
    steps_ref = jnp.where(bad, 0.0, steps_ref / jnp.where(bad, 1.0, ssum))

    # bias is folded as exp(b)*H0 in the kernel vs exp(xw+b) in the reference ->
    # slightly looser tolerances
    assert np.allclose(np.asarray(surv_func), np.asarray(sf_ref), rtol=1e-4, atol=1e-6)
    assert np.allclose(np.asarray(surv_steps), np.asarray(steps_ref), rtol=1e-3, atol=1e-5)

    print("KERNEL_OK")
</pallas_src>

<mosaic_0001>
module attributes {stable_mosaic.version = 11 : i64} {
  func.func @cox_kernel(%arg0: i32, %arg1: memref<8x32xf32, #tpu.memory_space<vmem>>, %arg2: memref<1x32xf32, #tpu.memory_space<vmem>>, %arg3: memref<1x128xf32, #tpu.memory_space<vmem>>, %arg4: memref<1x128xf32, #tpu.memory_space<vmem>>, %arg5: memref<8x128xf32, #tpu.memory_space<vmem>>, %arg6: memref<8x128xf32, #tpu.memory_space<vmem>>) attributes {dimension_semantics = [#tpu.dimension_semantics<parallel>], iteration_bounds = array<i64: 1>, scalar_prefetch = 0 : i64, scratch_operands = 0 : i64, tpu.core_type = #tpu.core_type<tc>, window_params = [{transform_indices = @transform_0, window_bounds = array<i64: 8, 32>}, {pipeline_mode = #tpu.pipeline_mode<synchronous>, transform_indices = @transform_1, window_bounds = array<i64: 1, 32>}, {pipeline_mode = #tpu.pipeline_mode<synchronous>, transform_indices = @transform_2, window_bounds = array<i64: 1, 128>}, {pipeline_mode = #tpu.pipeline_mode<synchronous>, transform_indices = @transform_3, window_bounds = array<i64: 1, 128>}, {transform_indices = @transform_4, window_bounds = array<i64: 8, 128>}, {transform_indices = @transform_5, window_bounds = array<i64: 8, 128>}]} {
    %c0 = arith.constant 0 : index
    %c0_0 = arith.constant 0 : index
    %0 = vector.load %arg1[%c0, %c0_0] : memref<8x32xf32, #tpu.memory_space<vmem>>, vector<8x32xf32>
    %c0_1 = arith.constant 0 : index
    %c0_2 = arith.constant 0 : index
    %1 = vector.load %arg2[%c0_1, %c0_2] : memref<1x32xf32, #tpu.memory_space<vmem>>, vector<1x32xf32>
    %c0_3 = arith.constant 0 : index
    %c0_4 = arith.constant 0 : index
    %2 = vector.load %arg3[%c0_3, %c0_4] : memref<1x128xf32, #tpu.memory_space<vmem>>, vector<1x128xf32>
    %c0_5 = arith.constant 0 : index
    %c0_6 = arith.constant 0 : index
    %3 = vector.load %arg4[%c0_5, %c0_6] : memref<1x128xf32, #tpu.memory_space<vmem>>, vector<1x128xf32>
    %4 = vector.broadcast %1 : vector<1x32xf32> to vector<8x32xf32>
    %5 = arith.mulf %0, %4 : vector<8x32xf32>
    %cst = arith.constant dense<0.000000e+00> : vector<8xf32>
    %6 = vector.multi_reduction <add>, %5, %cst [1] : vector<8x32xf32> to vector<8xf32>
    %7 = vector.shape_cast %6 : vector<8xf32> to vector<8x1xf32>
    %8 = math.exp %7 : vector<8x1xf32>
    %cst_7 = arith.constant 0.000000e+00 : f32
    %9 = vector.broadcast %cst_7 : f32 to vector<1x128xf32>
    %10 = arith.subf %9, %2 : vector<1x128xf32>
    %11 = vector.broadcast %10 : vector<1x128xf32> to vector<8x128xf32>
    %12 = vector.broadcast %8 : vector<8x1xf32> to vector<8x128xf32>
    %13 = arith.mulf %11, %12 : vector<8x128xf32>
    %14 = math.exp %13 : vector<8x128xf32>
    %cst_8 = arith.constant 1.000000e-07 : f32
    %15 = vector.broadcast %cst_8 : f32 to vector<8x128xf32>
    %16 = arith.maximumf %14, %15 : vector<8x128xf32>
    %c0_9 = arith.constant 0 : index
    %c0_10 = arith.constant 0 : index
    %17 = vector.load %arg5[%c0_9, %c0_10] : memref<8x128xf32, #tpu.memory_space<vmem>>, vector<8x128xf32>
    tpu.vector_store %arg5[%c0_9, %c0_10], %16 {strides = array<i32>} : memref<8x128xf32, #tpu.memory_space<vmem>>, vector<8x128xf32>,
    %cst_11 = arith.constant 0.000000e+00 : f32
    %18 = vector.broadcast %cst_11 : f32 to vector<1x128xf32>
    %19 = arith.subf %18, %3 : vector<1x128xf32>
    %20 = vector.broadcast %19 : vector<1x128xf32> to vector<8x128xf32>
    %21 = vector.broadcast %8 : vector<8x1xf32> to vector<8x128xf32>
    %22 = arith.mulf %20, %21 : vector<8x128xf32>
    %23 = math.exp %22 : vector<8x128xf32>
    %cst_12 = arith.constant 1.000000e-07 : f32
    %24 = vector.broadcast %cst_12 : f32 to vector<8x128xf32>
    %25 = arith.maximumf %23, %24 : vector<8x128xf32>
    %26 = arith.subf %25, %16 : vector<8x128xf32>
    %cst_13 = arith.constant dense<0.000000e+00> : vector<8xf32>
    %27 = vector.multi_reduction <add>, %26, %cst_13 [1] : vector<8x128xf32> to vector<8xf32>
    %28 = vector.shape_cast %27 : vector<8xf32> to vector<8x1xf32>
    %cst_14 = arith.constant 1.000000e-07 : f32
    %29 = vector.broadcast %cst_14 : f32 to vector<8x1xf32>
    %30 = arith.cmpf olt, %28, %29 : vector<8x1xf32>
    %cst_15 = arith.constant 1.000000e+00 : f32
    %31 = vector.broadcast %cst_15 : f32 to vector<8x1xf32>
    %32 = arith.select %30, %31, %28 : vector<8x1xi1>, vector<8x1xf32>
    %33 = vector.broadcast %32 : vector<8x1xf32> to vector<8x128xf32>
    %34 = arith.divf %26, %33 : vector<8x128xf32>
    %cst_16 = arith.constant 0.000000e+00 : f32
    %35 = vector.shape_cast %30 : vector<8x1xi1> to vector<8x1xi1>
    %36 = vector.broadcast %35 : vector<8x1xi1> to vector<8x128xi1>
    %37 = vector.broadcast %cst_16 : f32 to vector<8x128xf32>
    %38 = arith.select %36, %37, %34 : vector<8x128xi1>, vector<8x128xf32>
    %c0_17 = arith.constant 0 : index
    %c0_18 = arith.constant 0 : index
    %39 = vector.load %arg6[%c0_17, %c0_18] : memref<8x128xf32, #tpu.memory_space<vmem>>, vector<8x128xf32>
    tpu.vector_store %arg6[%c0_17, %c0_18], %38 {strides = array<i32>} : memref<8x128xf32, #tpu.memory_space<vmem>>, vector<8x128xf32>,
    return
  }
  func.func @transform_0(%arg0: i32) -> (i32, i32) {
    %c0_i32 = arith.constant 0 : i32
    %c0_i32_0 = arith.constant 0 : i32
    return %arg0, %c0_i32 : i32, i32
  }
  func.func @transform_1(%arg0: i32) -> (i32, i32) {
    %c0_i32 = arith.constant 0 : i32
    %c0_i32_0 = arith.constant 0 : i32
    %c0_i32_1 = arith.constant 0 : i32
    return %c0_i32, %c0_i32_0 : i32, i32
  }
  func.func @transform_2(%arg0: i32) -> (i32, i32) {
    %c0_i32 = arith.constant 0 : i32
    %c0_i32_0 = arith.constant 0 : i32
    %c0_i32_1 = arith.constant 0 : i32
    return %c0_i32, %c0_i32_0 : i32, i32
  }
  func.func @transform_3(%arg0: i32) -> (i32, i32) {
    %c0_i32 = arith.constant 0 : i32
    %c0_i32_0 = arith.constant 0 : i32
    %c0_i32_1 = arith.constant 0 : i32
    return %c0_i32, %c0_i32_0 : i32, i32
  }
  func.func @transform_4(%arg0: i32) -> (i32, i32) {
    %c0_i32 = arith.constant 0 : i32
    %c0_i32_0 = arith.constant 0 : i32
    return %arg0, %c0_i32 : i32, i32
  }
  func.func @transform_5(%arg0: i32) -> (i32, i32) {
    %c0_i32 = arith.constant 0 : i32
    %c0_i32_0 = arith.constant 0 : i32
    return %arg0, %c0_i32 : i32, i32
  }
}

</mosaic_0001>

<bundles_post_ra>
// kernel: tpu_custom_call.1
= control target key start
LH: loop header
LB: loop body
LE: loop exit
PB: predicated region body
PF: predicated region fallthrough
CT: control target
= control target key end

     0   :  { %11 = vsyncpa [#allocation3], 0  ;;  %s309_s0 = inlined_call_operand.hbm [shape: f32[8,32], index: 0, kind: input, shape index: {}]   ;;  %s310_s1 = inlined_call_operand.hbm [shape: f32[1,32], index: 1, kind: input, shape index: {}]   ;;  %s311_s2 = inlined_call_operand.vmem [shape: f32[1,128], index: 2, kind: input, shape index: {}]   ;;  %s312_s3 = inlined_call_operand.vmem [shape: f32[1,128], index: 3, kind: input, shape index: {}]   ;;  %s313_s4 = inlined_call_operand.hbm [shape: f32[8,128], index: 4, kind: output, shape index: {0}]   ;;  %s314_s5 = inlined_call_operand.hbm [shape: f32[8,128], index: 5, kind: output, shape index: {1}]  }
   0x1   :  { %12 = vsyncpa [#allocation6], 0 }
   0x2   :  { %13 = vsyncpa [#allocation4], 0 }
   0x3   :  { %14 = vsyncpa [#allocation9], 0  ;;  %s20_s20 = sshll.u32 %s309_s0, 4  ;;  %s255_s21 = smov [#allocation2]   ;;  %s21_s20 = int_to_ptr.hbm [resolvable:$true] %s20_s20 }
   0x4   :  { %s22_s22 = sshll.u32 %s255_s21, 4  ;;  %s31_s25 = sshll.u32 %s310_s1, 4  ;;  %s23_s22 = int_to_ptr.vmem [resolvable:$true] %s22_s22  ;;  %s32_s25 = int_to_ptr.hbm [resolvable:$true] %s31_s25 }
   0x5   :  { %25 = dma.hbm_to_vmem [thread:$0]  %s21_s20, 128, %s23_s22, [#allocation3]  }
   0x6   :  { %s256_s26 = smov [#allocation5]  }
   0x7   :  { %s33_s27 = sshll.u32 %s256_s26, 4  ;;  %s34_s27 = int_to_ptr.vmem [resolvable:$true] %s33_s27 }
   0x8   :  { %36 = dma.hbm_to_vmem [thread:$0]  %s32_s25, 16, %s34_s27, [#allocation6]  }
   0x9   :  { %247 = dma.done.wait [#allocation3], 128  }
   0xa   :  { %248 = vsyncadd [#allocation3], 4294967168 }
   0xb   :  { %249 = dma.done.wait [#allocation6], 16  }
   0xc   :  { %250 = vsyncadd [#allocation6], 4294967280  ;;  %v49_v0 = vld [vmem:[#allocation2] sm:$0xff]  ;;  %v142_v1 = vld [vmem:[#allocation5] ss:$0 sm:$0xff]  ;;  %vm57_vm0 = vcmask 261120  }
   0xd   :  { %v56_v2 = vmul.f32 %v142_v1, %v49_v0  ;;  %v51_v4 = vld [vmem:[%s311_s2] sm:$0x1]  ;;  %s257_s2 = smov [#allocation7]   ;;  %s111_s7 = sshll.u32 %s313_s4, 4  ;;  %s112_s7 = int_to_ptr.hbm [resolvable:$true] %s111_s7 }
   0xe   :  { %v52_v5 = vld [vmem:[%s312_s3] sm:$0x1]  ;;  %v63_v8 = vsub.f32 0.0, %v51_v4  ;;  %s109_s3 = sshll.u32 %s257_s2, 4  ;;  %s258_s4 = smov [#allocation8]   ;;  %s110_s3 = int_to_ptr.vmem [resolvable:$true] %s109_s3 }
   0xf   :  { %v58_v3 = vsel %vm57_vm0, %v56_v2, 0.0  ;;  %v72_v9 = vsub.f32 0.0, %v52_v5  ;;  %s120_s8 = sshll.u32 %s258_s4, 4  ;;  %s122_s11 = sshll.u32 %s314_s5, 4  ;;  %s121_s8 = int_to_ptr.vmem [resolvable:$true] %s120_s8  ;;  %s123_s11 = int_to_ptr.hbm [resolvable:$true] %s122_s11 }
  0x10   :  { %59 = vadd.xlane.f32.xlu0 %v58_v3  ;;  %v65_v10 = vperm.slane %v63_v8, 0 }
  0x11   :  { %v74_v11 = vperm.slane %v72_v9, 0 }
  0x83   :  { %v60_v6 = vpop.xlane.xlu0 %59 }
  0x84   :  { %v61_v7 = vmul.f32 1.442695, %v60_v6 }
  0x86   :  { %143 = vpow2.f32 %v61_v7 }
  0x8c   :  { %v144_v12 = vpop.eup %143 }
  0x8d   :  { %v67_v13 = vmul.f32 %v144_v12, %v65_v10  ;;  %v76_v14 = vmul.f32 %v144_v12, %v74_v11 }
  0x8f   :  { %v68_v15 = vmul.f32 1.442695, %v67_v13  ;;  %v77_v16 = vmul.f32 1.442695, %v76_v14 }
  0x91   :  { %145 = vpow2.f32 %v68_v15 }
  0x92   :  { %147 = vpow2.f32 %v77_v16 }
  0x97   :  { %v146_v17 = vpop.eup %145 }
  0x98   :  { %v148_v18 = vpop.eup %147  ;;  %v70_v19 = vmax.f32 %v146_v17, 1e-07 }
  0x99   :  { %v79_v20 = vmax.f32 %v148_v18, 1e-07 }
  0x9a   :  { %71 = vst [vmem:[#allocation7] sm:$0xff] %v70_v19 }
  0x9b   :  { %v80_v21 = vsub.f32 %v79_v20, %v70_v19  ;;  %114 = dma.vmem_to_hbm [thread:$0]  %s110_s3, 128, %s112_s7, [#allocation4]  }
  0x9d   :  { %81 = vadd.xlane.f32.xlu0 %v80_v21 }
 0x110   :  { %v82_v22 = vpop.xlane.xlu0 %81 }
 0x111   :  { %vm83_vm1 = vcmp.lt.f32.partialorder %v82_v22, 1e-07 }
 0x112   :  { %v84_v23 = vsel %vm83_vm1, 1.0, %v82_v22 }
 0x113   :  { %149 = vrcp.f32 %v84_v23  ;;  %v96_v27 = vand.u32 2147483648, %v84_v23  ;;  %v94_v29 = vand.u32 2147483647, %v84_v23  ;;  %vm90_vm3 = vweird.f32 %v84_v23 }
 0x115   :  { %v97_v31 = vor.u32 1.1754944e-38, %v96_v27  ;;  %vm95_vm5 = vcmp.eq.f32.partialorder %v94_v29, 8.507059e+37 }
 0x119   :  { %v150_v24 = vpop.eup %149 }
 0x11a   :  { %v86_v25 = vmul.f32 %v150_v24, %v84_v23  ;;  %vm91_vm2 = vweird.f32 %v150_v24 }
 0x11b   :  { %vm92_vm4 = vmor %vm90_vm3, %vm91_vm2 }
 0x11c   :  { %v87_v26 = vsub.f32 1.0, %v86_v25 }
 0x11e   :  { %v88_v28 = vmul.f32 %v150_v24, %v87_v26 }
 0x120   :  { %v89_v30 = vadd.f32 %v150_v24, %v88_v28 }
 0x122   :  { %v93_v32 = vsel %vm92_vm4, %v150_v24, %v89_v30 }
 0x123   :  { %v98_v33 = vsel %vm95_vm5, %v97_v31, %v93_v32 }
 0x124   :  { %v99_v34 = vmul.f32 %v98_v33, %v80_v21 }
 0x126   :  { %v102_v35 = vsel %vm83_vm1, 0.0, %v99_v34 }
 0x127   :  { %103 = vst [vmem:[#allocation8] sm:$0xff] %v102_v35 }
 0x128   :  { %125 = dma.vmem_to_hbm [thread:$0]  %s121_s8, 128, %s123_s11, [#allocation9]  }
 0x129   :  { %251 = dma.done.wait [#allocation4], 128  }
 0x12a   :  { %252 = vsyncadd [#allocation4], 4294967168 }
 0x12b   :  { %253 = dma.done.wait [#allocation9], 128  }
 0x12c   :  { %254 = vsyncadd [#allocation9], 4294967168 }
 0x12d   :  { %134 = vsyncpa [#allocation3], 1 }
 0x12e   :  { %135 = vsyncpa [#allocation6], 1 }
 0x12f   :  { %136 = vsyncpa [#allocation4], 1 }
 0x130   :  { %137 = vsyncpa [#allocation9], 1 }

</bundles_post_ra>
